<compile_context>
chip_gen: v5e
topology: v5e:2x2
jax: 0.10.0
libtpu: 0.0.40
codegen_flags: <defaults>
</compile_context>

<pallas_src>
import jax
import jax.numpy as jnp
from jax.experimental import pallas as pl
from jax.experimental.pallas import tpu as pltpu
import numpy as np

_UNROLL_T_MAX = 16


def crf_nll_kernel(em_ref, tags_ref, mask_ref, trans_t_ref, out_ref):
    # em_ref:      (T, N, TB) f32  time-major emissions, batch on lanes
    # tags_ref:    (T, 1, TB) i32
    # mask_ref:    (T, 1, TB) f32
    # trans_t_ref: (N, N)     f32  TRANSPOSED transitions: trans_t[j,i] = trans[i,j]
    # out_ref:     (1, 1)     f32 (SMEM) per-tile sum of (logZ - joint score)
    T, N, TB = em_ref.shape

    trans_t = trans_t_ref[...]                               # (N, N)
    # Column-max of the original transitions == row-max of the transpose.
    cmax = jnp.max(trans_t, axis=1, keepdims=True)           # (N, 1)
    e_trans_t = jnp.exp(trans_t - cmax)                      # (N, N), entries in (0, 1]

    n_iota = jax.lax.broadcasted_iota(jnp.int32, (N, TB), 0)

    def onehot(tag_row):                                     # (1, TB) i32 -> (N, TB) f32
        return (tag_row == n_iota).astype(jnp.float32)

    # ---- t = 0: numerator emission term + partition init ----
    em0 = em_ref[0]                                          # (N, TB)
    oh0 = onehot(tags_ref[0])                                # (N, TB)
    acc0 = em0 * oh0 * mask_ref[0]                           # (N, TB)
    alpha0 = em0        # mask[:, 0] intentionally ignored, exactly as in the module

    def step(alpha, oh_prev, acc, em_t, tag_t, mask_t):
        oh_t = onehot(tag_t)                                 # (N, TB)
        # Numerator: emissions[t, tags[t]] + transitions[tags[t-1], tags[t]].
        # rows[j, b] = transitions[tags[t-1, b], j] via one lane-dense MXU matmul.
        rows = jnp.dot(trans_t, oh_prev, preferred_element_type=jnp.float32)
        acc = acc + (em_t + rows) * oh_t * mask_t
        # Log-partition recursion. Step-t emission added along the PREVIOUS-tag
        # axis before the logsumexp (module quirk):
        #   alpha'[j] = logsumexp_i(alpha[i] + em[t, i] + trans[i, j])
        # Exp-domain-matmul logsumexp (exact; both exponents <= 0, no overflow):
        #   alpha'[j] = m + cmax[j] + log( exp(a - m) @ exp(trans - cmax) )[j]
        a = alpha + em_t                                     # (N, TB)
        m = jnp.max(a, axis=0, keepdims=True)                # (1, TB) sublane reduce
        p = jnp.exp(a - m)                                   # (N, TB)
        s = jnp.dot(e_trans_t, p, preferred_element_type=jnp.float32)
        alpha_t = m + jnp.log(s) + cmax                      # (N, TB)
        alpha = jnp.where(mask_t > 0.0, alpha_t, alpha)
        return alpha, oh_t, acc

    if T <= _UNROLL_T_MAX:
        # Small static T: trace-time unrolled, static leading-axis tile reads.
        alpha, oh_prev, acc = alpha0, oh0, acc0
        for t in range(1, T):
            alpha, oh_prev, acc = step(alpha, oh_prev, acc,
                                       em_ref[t], tags_ref[t], mask_ref[t])
    else:
        # Large T: keep code size / vreg live ranges bounded; dynamic indexing
        # along the leading (time) axis of the refs is a free tile select.
        def body(t, carry):
            alpha, oh_prev, acc = carry
            return step(alpha, oh_prev, acc,
                        em_ref[t], tags_ref[t], mask_ref[t])
        alpha, oh_prev, acc = jax.lax.fori_loop(1, T, body, (alpha0, oh0, acc0))

    # logZ[b] = logsumexp_j alpha[j, b]  (lane-dense sublane reduction)
    m2 = jnp.max(alpha, axis=0, keepdims=True)               # (1, TB)
    logz = jnp.log(jnp.sum(jnp.exp(alpha - m2), axis=0, keepdims=True)) + m2

    # Per-tile partial sum of (logZ - score); the wrapper divides by B.
    out_ref[0, 0] = jnp.sum(logz) - jnp.sum(acc)


def _pick_block_b(B, T, N, budget_bytes=12 * 1024 * 1024):
    """Batch-tile (lane) size.

    Legality: tb must divide B and be either a multiple of 128 (lane tile) or
    the full batch.  Working set per batch lane (f32): double-buffered
    emissions block (2*T*N) + double-buffered tags/mask blocks (4*T) + ~16
    (N,)-rows of live kernel intermediates.

    Policy: the largest tile that fits the budget (fewest grid steps, best for
    single-TC v5e/v6e); when B >= 256 prefer an even tile count >= 2 with each
    tile still lane-dense (>= 128 lanes) so v7x megacore shards the "parallel"
    batch axis across both TensorCores.
    """
    per_lane = 4 * (2 * T * N + 4 * T + 16 * N)
    cap = max(1, budget_bytes // per_lane)

    candidates = []
    if B <= cap:
        candidates.append(B)
    c = 128
    while c <= min(B - 1, cap):
        if B % c == 0:
            candidates.append(c)
        c += 128
    if not candidates:
        # No legal lane tiling fits the budget; fall back to the full batch and
        # rely on the explicit vmem limit headroom.
        # TODO(synk): pad B to a multiple of 128 for huge, non-divisible batches.
        return B

    best = max(candidates)
    if B >= 256:
        multi = [c for c in candidates
                 if c < B and c >= 128 and (B // c) % 2 == 0]
        if multi:
            best = max(multi)
    return best


def crf_nll(emissions, tags, mask, transitions):
    """Scalar mean NLL; matches CRF.forward(emissions, tags, mask)."""
    emissions = emissions.astype(jnp.float32)
    tags = tags.astype(jnp.int32)
    if mask is None:
        mask = jnp.ones(tags.shape, dtype=jnp.float32)
    maskf = mask.astype(jnp.float32)
    transitions = transitions.astype(jnp.float32)

    B, T, N = emissions.shape

    # Lane-dense, time-major layouts (batch on the 128-lane axis). Wrapper-side
    # transposes are layout plumbing only.
    em_tm = jnp.transpose(emissions, (1, 2, 0))          # (T, N, B)
    tags_tm = jnp.transpose(tags, (1, 0))[:, None, :]    # (T, 1, B)
    mask_tm = jnp.transpose(maskf, (1, 0))[:, None, :]   # (T, 1, B)
    trans_t = jnp.transpose(transitions, (1, 0))         # (N, N), transposed once

    tb = _pick_block_b(B, T, N)
    num_tiles = B // tb

    flops = int(4 * B * T * N * N + 12 * B * T * N)      # 2 MXU matmuls / step + VPU
    transcendentals = int(2 * B * T * N)                  # exp + log per step
    bytes_accessed = int(4 * (B * T * N + 2 * B * T + N * N + num_tiles))

    partials = pl.pallas_call(
        crf_nll_kernel,
        out_shape=jax.ShapeDtypeStruct((num_tiles, 1), jnp.float32),
        grid=(num_tiles,),
        in_specs=[
            pl.BlockSpec((T, N, tb), lambda i: (0, 0, i)),   # emissions (time-major)
            pl.BlockSpec((T, 1, tb), lambda i: (0, 0, i)),   # tags
            pl.BlockSpec((T, 1, tb), lambda i: (0, 0, i)),   # mask
            pl.BlockSpec((N, N), lambda i: (0, 0)),          # transitions^T
        ],
        out_specs=pl.BlockSpec((1, 1), lambda i: (i, 0),
                               memory_space=pltpu.MemorySpace.SMEM),
        compiler_params=pltpu.CompilerParams(
            dimension_semantics=("parallel",),
            vmem_limit_bytes=32 * 1024 * 1024),
        cost_estimate=pl.CostEstimate(flops=flops,
                                      transcendentals=transcendentals,
                                      bytes_accessed=bytes_accessed),
    )(em_tm, tags_tm, mask_tm, trans_t)
    return jnp.sum(partials) / B


def crf_nll_ref(emissions, tags, mask, trans):
    """Pure-JAX mirror of the PyTorch forward (for verification)."""
    B, T, N = emissions.shape
    maskf = mask.astype(jnp.float32)
    batch_idx = jnp.arange(B)
    score = jnp.zeros((B,), jnp.float32)
    for i in range(T):
        curr = tags[:, i]
        score = score + emissions[batch_idx, i, curr] * maskf[:, i]
        if i > 0:
            prev = tags[:, i - 1]
            score = score + trans[prev, curr] * maskf[:, i]
    alpha = emissions[:, 0]
    for t in range(1, T):
        s = alpha[:, :, None] + trans[None, :, :] + emissions[:, t, :][:, :, None]
        alpha_t = jax.scipy.special.logsumexp(s, axis=1)
        alpha = jnp.where(maskf[:, t:t + 1] > 0, alpha_t, alpha)
    logz = jax.scipy.special.logsumexp(alpha, axis=1)
    return jnp.mean(logz - score)


if __name__ == "__main__":
    def run_case(B, T, N, use_mask, key):
        k_em, k_tags, k_trans, k_len = jax.random.split(key, 4)
        emissions = jax.random.normal(k_em, (B, T, N), dtype=jnp.float32)
        tags = jax.random.randint(k_tags, (B, T), 0, N, dtype=jnp.int32)
        if use_mask:
            lengths = jax.random.randint(k_len, (B,), 1, T + 1)   # first step always on
            mask = (jnp.arange(T)[None, :] < lengths[:, None]).astype(jnp.float32)
        else:
            mask = jnp.ones((B, T), dtype=jnp.float32)            # module default (mask=None)
        # Deterministic stand-in for nn.Parameter(torch.randn(num_tags, num_tags))
        transitions = jax.random.normal(k_trans, (N, N), dtype=jnp.float32)

        loss = jax.block_until_ready(crf_nll(emissions, tags, mask, transitions))
        ref = crf_nll_ref(emissions, tags, mask, transitions)
        np.testing.assert_allclose(np.asarray(loss), np.asarray(ref),
                                   rtol=1e-4, atol=1e-4)

    keys = jax.random.split(jax.random.PRNGKey(0), 3)
    run_case(8, 8, 8, use_mask=False, key=keys[0])    # module defaults, unrolled path
    run_case(16, 12, 12, use_mask=True, key=keys[1])  # padded sequences, unrolled path
    run_case(8, 24, 8, use_mask=True, key=keys[2])    # large-T fori_loop path

    print("KERNEL_OK")
</pallas_src>

<mosaic_0001>
module attributes {stable_mosaic.version = 11 : i64} {
  func.func @crf_nll_kernel(%arg0: i32, %arg1: memref<8x8x8xf32, #tpu.memory_space<vmem>>, %arg2: memref<8x1x8xi32, #tpu.memory_space<vmem>>, %arg3: memref<8x1x8xf32, #tpu.memory_space<vmem>>, %arg4: memref<8x8xf32, #tpu.memory_space<vmem>>, %arg5: memref<1x1xf32, #tpu.memory_space<smem>>) attributes {dimension_semantics = [#tpu.dimension_semantics<parallel>], iteration_bounds = array<i64: 1>, scalar_prefetch = 0 : i64, scratch_operands = 0 : i64, tpu.core_type = #tpu.core_type<tc>, window_params = [{transform_indices = @transform_0, window_bounds = array<i64: 8, 8, 8>}, {transform_indices = @transform_1, window_bounds = array<i64: 8, 1, 8>}, {transform_indices = @transform_2, window_bounds = array<i64: 8, 1, 8>}, {pipeline_mode = #tpu.pipeline_mode<synchronous>, transform_indices = @transform_3, window_bounds = array<i64: 8, 8>}, {transform_indices = @transform_4, window_bounds = array<i64: 1, 1>}]} {
    %c0 = arith.constant 0 : index
    %c0_0 = arith.constant 0 : index
    %0 = vector.load %arg4[%c0, %c0_0] : memref<8x8xf32, #tpu.memory_space<vmem>>, vector<8x8xf32>
    %cst = arith.constant dense<0xFF800000> : vector<8xf32>
    %1 = vector.multi_reduction <maximumf>, %0, %cst [1] : vector<8x8xf32> to vector<8xf32>
    %2 = vector.shape_cast %1 : vector<8xf32> to vector<8x1xf32>
    %3 = vector.broadcast %2 : vector<8x1xf32> to vector<8x8xf32>
    %4 = arith.subf %0, %3 : vector<8x8xf32>
    %5 = math.exp %4 : vector<8x8xf32>
    %6 = tpu.iota {dimensions = array<i32: 0>} : vector<8x8xi32>
    %c0_1 = arith.constant 0 : index
    %c0_2 = arith.constant 0 : index
    %c0_3 = arith.constant 0 : index
    %7 = vector.load %arg1[%c0_1, %c0_2, %c0_3] : memref<8x8x8xf32, #tpu.memory_space<vmem>>, vector<1x8x8xf32>
    %8 = vector.shape_cast %7 : vector<1x8x8xf32> to vector<8x8xf32>
    %c0_4 = arith.constant 0 : index
    %c0_5 = arith.constant 0 : index
    %c0_6 = arith.constant 0 : index
    %9 = vector.load %arg2[%c0_4, %c0_5, %c0_6] : memref<8x1x8xi32, #tpu.memory_space<vmem>>, vector<1x1x8xi32>
    %10 = vector.shape_cast %9 : vector<1x1x8xi32> to vector<1x8xi32>
    %11 = vector.broadcast %10 : vector<1x8xi32> to vector<8x8xi32>
    %12 = arith.cmpi eq, %11, %6 : vector<8x8xi32>
    %13 = arith.extui %12 : vector<8x8xi1> to vector<8x8xi32>
    %14 = arith.sitofp %13 : vector<8x8xi32> to vector<8x8xf32>
    %15 = arith.mulf %8, %14 : vector<8x8xf32>
    %c0_7 = arith.constant 0 : index
    %c0_8 = arith.constant 0 : index
    %c0_9 = arith.constant 0 : index
    %16 = vector.load %arg3[%c0_7, %c0_8, %c0_9] : memref<8x1x8xf32, #tpu.memory_space<vmem>>, vector<1x1x8xf32>
    %17 = vector.shape_cast %16 : vector<1x1x8xf32> to vector<1x8xf32>
    %18 = vector.broadcast %17 : vector<1x8xf32> to vector<8x8xf32>
    %19 = arith.mulf %15, %18 : vector<8x8xf32>
    %c1 = arith.constant 1 : index
    %c0_10 = arith.constant 0 : index
    %c0_11 = arith.constant 0 : index
    %20 = vector.load %arg1[%c1, %c0_10, %c0_11] : memref<8x8x8xf32, #tpu.memory_space<vmem>>, vector<1x8x8xf32>
    %21 = vector.shape_cast %20 : vector<1x8x8xf32> to vector<8x8xf32>
    %c1_12 = arith.constant 1 : index
    %c0_13 = arith.constant 0 : index
    %c0_14 = arith.constant 0 : index
    %22 = vector.load %arg2[%c1_12, %c0_13, %c0_14] : memref<8x1x8xi32, #tpu.memory_space<vmem>>, vector<1x1x8xi32>
    %23 = vector.shape_cast %22 : vector<1x1x8xi32> to vector<1x8xi32>
    %c1_15 = arith.constant 1 : index
    %c0_16 = arith.constant 0 : index
    %c0_17 = arith.constant 0 : index
    %24 = vector.load %arg3[%c1_15, %c0_16, %c0_17] : memref<8x1x8xf32, #tpu.memory_space<vmem>>, vector<1x1x8xf32>
    %25 = vector.shape_cast %24 : vector<1x1x8xf32> to vector<1x8xf32>
    %26 = vector.broadcast %23 : vector<1x8xi32> to vector<8x8xi32>
    %27 = arith.cmpi eq, %26, %6 : vector<8x8xi32>
    %28 = arith.extui %27 : vector<8x8xi1> to vector<8x8xi32>
    %29 = arith.sitofp %28 : vector<8x8xi32> to vector<8x8xf32>
    %cst_18 = arith.constant dense<0.000000e+00> : vector<8x8xf32>
    %30 = tpu.matmul %0, %14, %cst_18 {dimension_numbers = #tpu.dot_dimension_numbers<[1], [0], [0], [1], [0, 0, 1, 1], [], []>} : vector<8x8xf32>, vector<8x8xf32>, vector<8x8xf32> -> vector<8x8xf32>
    %31 = arith.addf %21, %30 : vector<8x8xf32>
    %32 = arith.mulf %31, %29 : vector<8x8xf32>
    %33 = vector.broadcast %25 : vector<1x8xf32> to vector<8x8xf32>
    %34 = arith.mulf %32, %33 : vector<8x8xf32>
    %35 = arith.addf %19, %34 : vector<8x8xf32>
    %36 = arith.addf %8, %21 : vector<8x8xf32>
    %cst_19 = arith.constant dense<0xFF800000> : vector<8xf32>
    %37 = vector.multi_reduction <maximumf>, %36, %cst_19 [0] : vector<8x8xf32> to vector<8xf32>
    %38 = vector.shape_cast %37 : vector<8xf32> to vector<1x8xf32>
    %39 = vector.broadcast %38 : vector<1x8xf32> to vector<8x8xf32>
    %40 = arith.subf %36, %39 : vector<8x8xf32>
    %41 = math.exp %40 : vector<8x8xf32>
    %cst_20 = arith.constant dense<0.000000e+00> : vector<8x8xf32>
    %42 = tpu.matmul %5, %41, %cst_20 {dimension_numbers = #tpu.dot_dimension_numbers<[1], [0], [0], [1], [0, 0, 1, 1], [], []>} : vector<8x8xf32>, vector<8x8xf32>, vector<8x8xf32> -> vector<8x8xf32>
    %43 = math.log %42 : vector<8x8xf32>
    %44 = vector.broadcast %38 : vector<1x8xf32> to vector<8x8xf32>
    %45 = arith.addf %44, %43 : vector<8x8xf32>
    %46 = vector.broadcast %2 : vector<8x1xf32> to vector<8x8xf32>
    %47 = arith.addf %45, %46 : vector<8x8xf32>
    %cst_21 = arith.constant 0.000000e+00 : f32
    %48 = vector.broadcast %cst_21 : f32 to vector<1x8xf32>
    %49 = arith.cmpf ogt, %25, %48 : vector<1x8xf32>
    %50 = vector.shape_cast %49 : vector<1x8xi1> to vector<1x8xi1>
    %51 = vector.broadcast %50 : vector<1x8xi1> to vector<8x8xi1>
    %52 = arith.select %51, %47, %8 : vector<8x8xi1>, vector<8x8xf32>
    %c2 = arith.constant 2 : index
    %c0_22 = arith.constant 0 : index
    %c0_23 = arith.constant 0 : index
    %53 = vector.load %arg1[%c2, %c0_22, %c0_23] : memref<8x8x8xf32, #tpu.memory_space<vmem>>, vector<1x8x8xf32>
    %54 = vector.shape_cast %53 : vector<1x8x8xf32> to vector<8x8xf32>
    %c2_24 = arith.constant 2 : index
    %c0_25 = arith.constant 0 : index
    %c0_26 = arith.constant 0 : index
    %55 = vector.load %arg2[%c2_24, %c0_25, %c0_26] : memref<8x1x8xi32, #tpu.memory_space<vmem>>, vector<1x1x8xi32>
    %56 = vector.shape_cast %55 : vector<1x1x8xi32> to vector<1x8xi32>
    %c2_27 = arith.constant 2 : index
    %c0_28 = arith.constant 0 : index
    %c0_29 = arith.constant 0 : index
    %57 = vector.load %arg3[%c2_27, %c0_28, %c0_29] : memref<8x1x8xf32, #tpu.memory_space<vmem>>, vector<1x1x8xf32>
    %58 = vector.shape_cast %57 : vector<1x1x8xf32> to vector<1x8xf32>
    %59 = vector.broadcast %56 : vector<1x8xi32> to vector<8x8xi32>
    %60 = arith.cmpi eq, %59, %6 : vector<8x8xi32>
    %61 = arith.extui %60 : vector<8x8xi1> to vector<8x8xi32>
    %62 = arith.sitofp %61 : vector<8x8xi32> to vector<8x8xf32>
    %cst_30 = arith.constant dense<0.000000e+00> : vector<8x8xf32>
    %63 = tpu.matmul %0, %29, %cst_30 {dimension_numbers = #tpu.dot_dimension_numbers<[1], [0], [0], [1], [0, 0, 1, 1], [], []>} : vector<8x8xf32>, vector<8x8xf32>, vector<8x8xf32> -> vector<8x8xf32>
    %64 = arith.addf %54, %63 : vector<8x8xf32>
    %65 = arith.mulf %64, %62 : vector<8x8xf32>
    %66 = vector.broadcast %58 : vector<1x8xf32> to vector<8x8xf32>
    %67 = arith.mulf %65, %66 : vector<8x8xf32>
    %68 = arith.addf %35, %67 : vector<8x8xf32>
    %69 = arith.addf %52, %54 : vector<8x8xf32>
    %cst_31 = arith.constant dense<0xFF800000> : vector<8xf32>
    %70 = vector.multi_reduction <maximumf>, %69, %cst_31 [0] : vector<8x8xf32> to vector<8xf32>
    %71 = vector.shape_cast %70 : vector<8xf32> to vector<1x8xf32>
    %72 = vector.broadcast %71 : vector<1x8xf32> to vector<8x8xf32>
    %73 = arith.subf %69, %72 : vector<8x8xf32>
    %74 = math.exp %73 : vector<8x8xf32>
    %cst_32 = arith.constant dense<0.000000e+00> : vector<8x8xf32>
    %75 = tpu.matmul %5, %74, %cst_32 {dimension_numbers = #tpu.dot_dimension_numbers<[1], [0], [0], [1], [0, 0, 1, 1], [], []>} : vector<8x8xf32>, vector<8x8xf32>, vector<8x8xf32> -> vector<8x8xf32>
    %76 = math.log %75 : vector<8x8xf32>
    %77 = vector.broadcast %71 : vector<1x8xf32> to vector<8x8xf32>
    %78 = arith.addf %77, %76 : vector<8x8xf32>
    %79 = vector.broadcast %2 : vector<8x1xf32> to vector<8x8xf32>
    %80 = arith.addf %78, %79 : vector<8x8xf32>
    %cst_33 = arith.constant 0.000000e+00 : f32
    %81 = vector.broadcast %cst_33 : f32 to vector<1x8xf32>
    %82 = arith.cmpf ogt, %58, %81 : vector<1x8xf32>
    %83 = vector.shape_cast %82 : vector<1x8xi1> to vector<1x8xi1>
    %84 = vector.broadcast %83 : vector<1x8xi1> to vector<8x8xi1>
    %85 = arith.select %84, %80, %52 : vector<8x8xi1>, vector<8x8xf32>
    %c3 = arith.constant 3 : index
    %c0_34 = arith.constant 0 : index
    %c0_35 = arith.constant 0 : index
    %86 = vector.load %arg1[%c3, %c0_34, %c0_35] : memref<8x8x8xf32, #tpu.memory_space<vmem>>, vector<1x8x8xf32>
    %87 = vector.shape_cast %86 : vector<1x8x8xf32> to vector<8x8xf32>
    %c3_36 = arith.constant 3 : index
    %c0_37 = arith.constant 0 : index
    %c0_38 = arith.constant 0 : index
    %88 = vector.load %arg2[%c3_36, %c0_37, %c0_38] : memref<8x1x8xi32, #tpu.memory_space<vmem>>, vector<1x1x8xi32>
    %89 = vector.shape_cast %88 : vector<1x1x8xi32> to vector<1x8xi32>
    %c3_39 = arith.constant 3 : index
    %c0_40 = arith.constant 0 : index
    %c0_41 = arith.constant 0 : index
    %90 = vector.load %arg3[%c3_39, %c0_40, %c0_41] : memref<8x1x8xf32, #tpu.memory_space<vmem>>, vector<1x1x8xf32>
    %91 = vector.shape_cast %90 : vector<1x1x8xf32> to vector<1x8xf32>
    %92 = vector.broadcast %89 : vector<1x8xi32> to vector<8x8xi32>
    %93 = arith.cmpi eq, %92, %6 : vector<8x8xi32>
    %94 = arith.extui %93 : vector<8x8xi1> to vector<8x8xi32>
    %95 = arith.sitofp %94 : vector<8x8xi32> to vector<8x8xf32>
    %cst_42 = arith.constant dense<0.000000e+00> : vector<8x8xf32>
    %96 = tpu.matmul %0, %62, %cst_42 {dimension_numbers = #tpu.dot_dimension_numbers<[1], [0], [0], [1], [0, 0, 1, 1], [], []>} : vector<8x8xf32>, vector<8x8xf32>, vector<8x8xf32> -> vector<8x8xf32>
    %97 = arith.addf %87, %96 : vector<8x8xf32>
    %98 = arith.mulf %97, %95 : vector<8x8xf32>
    %99 = vector.broadcast %91 : vector<1x8xf32> to vector<8x8xf32>
    %100 = arith.mulf %98, %99 : vector<8x8xf32>
    %101 = arith.addf %68, %100 : vector<8x8xf32>
    %102 = arith.addf %85, %87 : vector<8x8xf32>
    %cst_43 = arith.constant dense<0xFF800000> : vector<8xf32>
    %103 = vector.multi_reduction <maximumf>, %102, %cst_43 [0] : vector<8x8xf32> to vector<8xf32>
    %104 = vector.shape_cast %103 : vector<8xf32> to vector<1x8xf32>
    %105 = vector.broadcast %104 : vector<1x8xf32> to vector<8x8xf32>
    %106 = arith.subf %102, %105 : vector<8x8xf32>
    %107 = math.exp %106 : vector<8x8xf32>
    %cst_44 = arith.constant dense<0.000000e+00> : vector<8x8xf32>
    %108 = tpu.matmul %5, %107, %cst_44 {dimension_numbers = #tpu.dot_dimension_numbers<[1], [0], [0], [1], [0, 0, 1, 1], [], []>} : vector<8x8xf32>, vector<8x8xf32>, vector<8x8xf32> -> vector<8x8xf32>
    %109 = math.log %108 : vector<8x8xf32>
    %110 = vector.broadcast %104 : vector<1x8xf32> to vector<8x8xf32>
    %111 = arith.addf %110, %109 : vector<8x8xf32>
    %112 = vector.broadcast %2 : vector<8x1xf32> to vector<8x8xf32>
    %113 = arith.addf %111, %112 : vector<8x8xf32>
    %cst_45 = arith.constant 0.000000e+00 : f32
    %114 = vector.broadcast %cst_45 : f32 to vector<1x8xf32>
    %115 = arith.cmpf ogt, %91, %114 : vector<1x8xf32>
    %116 = vector.shape_cast %115 : vector<1x8xi1> to vector<1x8xi1>
    %117 = vector.broadcast %116 : vector<1x8xi1> to vector<8x8xi1>
    %118 = arith.select %117, %113, %85 : vector<8x8xi1>, vector<8x8xf32>
    %c4 = arith.constant 4 : index
    %c0_46 = arith.constant 0 : index
    %c0_47 = arith.constant 0 : index
    %119 = vector.load %arg1[%c4, %c0_46, %c0_47] : memref<8x8x8xf32, #tpu.memory_space<vmem>>, vector<1x8x8xf32>
    %120 = vector.shape_cast %119 : vector<1x8x8xf32> to vector<8x8xf32>
    %c4_48 = arith.constant 4 : index
    %c0_49 = arith.constant 0 : index
    %c0_50 = arith.constant 0 : index
    %121 = vector.load %arg2[%c4_48, %c0_49, %c0_50] : memref<8x1x8xi32, #tpu.memory_space<vmem>>, vector<1x1x8xi32>
    %122 = vector.shape_cast %121 : vector<1x1x8xi32> to vector<1x8xi32>
    %c4_51 = arith.constant 4 : index
    %c0_52 = arith.constant 0 : index
    %c0_53 = arith.constant 0 : index
    %123 = vector.load %arg3[%c4_51, %c0_52, %c0_53] : memref<8x1x8xf32, #tpu.memory_space<vmem>>, vector<1x1x8xf32>
    %124 = vector.shape_cast %123 : vector<1x1x8xf32> to vector<1x8xf32>
    %125 = vector.broadcast %122 : vector<1x8xi32> to vector<8x8xi32>
    %126 = arith.cmpi eq, %125, %6 : vector<8x8xi32>
    %127 = arith.extui %126 : vector<8x8xi1> to vector<8x8xi32>
    %128 = arith.sitofp %127 : vector<8x8xi32> to vector<8x8xf32>
    %cst_54 = arith.constant dense<0.000000e+00> : vector<8x8xf32>
    %129 = tpu.matmul %0, %95, %cst_54 {dimension_numbers = #tpu.dot_dimension_numbers<[1], [0], [0], [1], [0, 0, 1, 1], [], []>} : vector<8x8xf32>, vector<8x8xf32>, vector<8x8xf32> -> vector<8x8xf32>
    %130 = arith.addf %120, %129 : vector<8x8xf32>
    %131 = arith.mulf %130, %128 : vector<8x8xf32>
    %132 = vector.broadcast %124 : vector<1x8xf32> to vector<8x8xf32>
    %133 = arith.mulf %131, %132 : vector<8x8xf32>
    %134 = arith.addf %101, %133 : vector<8x8xf32>
    %135 = arith.addf %118, %120 : vector<8x8xf32>
    %cst_55 = arith.constant dense<0xFF800000> : vector<8xf32>
    %136 = vector.multi_reduction <maximumf>, %135, %cst_55 [0] : vector<8x8xf32> to vector<8xf32>
    %137 = vector.shape_cast %136 : vector<8xf32> to vector<1x8xf32>
    %138 = vector.broadcast %137 : vector<1x8xf32> to vector<8x8xf32>
    %139 = arith.subf %135, %138 : vector<8x8xf32>
    %140 = math.exp %139 : vector<8x8xf32>
    %cst_56 = arith.constant dense<0.000000e+00> : vector<8x8xf32>
    %141 = tpu.matmul %5, %140, %cst_56 {dimension_numbers = #tpu.dot_dimension_numbers<[1], [0], [0], [1], [0, 0, 1, 1], [], []>} : vector<8x8xf32>, vector<8x8xf32>, vector<8x8xf32> -> vector<8x8xf32>
    %142 = math.log %141 : vector<8x8xf32>
    %143 = vector.broadcast %137 : vector<1x8xf32> to vector<8x8xf32>
    %144 = arith.addf %143, %142 : vector<8x8xf32>
    %145 = vector.broadcast %2 : vector<8x1xf32> to vector<8x8xf32>
    %146 = arith.addf %144, %145 : vector<8x8xf32>
    %cst_57 = arith.constant 0.000000e+00 : f32
    %147 = vector.broadcast %cst_57 : f32 to vector<1x8xf32>
    %148 = arith.cmpf ogt, %124, %147 : vector<1x8xf32>
    %149 = vector.shape_cast %148 : vector<1x8xi1> to vector<1x8xi1>
    %150 = vector.broadcast %149 : vector<1x8xi1> to vector<8x8xi1>
    %151 = arith.select %150, %146, %118 : vector<8x8xi1>, vector<8x8xf32>
    %c5 = arith.constant 5 : index
    %c0_58 = arith.constant 0 : index
    %c0_59 = arith.constant 0 : index
    %152 = vector.load %arg1[%c5, %c0_58, %c0_59] : memref<8x8x8xf32, #tpu.memory_space<vmem>>, vector<1x8x8xf32>
    %153 = vector.shape_cast %152 : vector<1x8x8xf32> to vector<8x8xf32>
    %c5_60 = arith.constant 5 : index
    %c0_61 = arith.constant 0 : index
    %c0_62 = arith.constant 0 : index
    %154 = vector.load %arg2[%c5_60, %c0_61, %c0_62] : memref<8x1x8xi32, #tpu.memory_space<vmem>>, vector<1x1x8xi32>
    %155 = vector.shape_cast %154 : vector<1x1x8xi32> to vector<1x8xi32>
    %c5_63 = arith.constant 5 : index
    %c0_64 = arith.constant 0 : index
    %c0_65 = arith.constant 0 : index
    %156 = vector.load %arg3[%c5_63, %c0_64, %c0_65] : memref<8x1x8xf32, #tpu.memory_space<vmem>>, vector<1x1x8xf32>
    %157 = vector.shape_cast %156 : vector<1x1x8xf32> to vector<1x8xf32>
    %158 = vector.broadcast %155 : vector<1x8xi32> to vector<8x8xi32>
    %159 = arith.cmpi eq, %158, %6 : vector<8x8xi32>
    %160 = arith.extui %159 : vector<8x8xi1> to vector<8x8xi32>
    %161 = arith.sitofp %160 : vector<8x8xi32> to vector<8x8xf32>
    %cst_66 = arith.constant dense<0.000000e+00> : vector<8x8xf32>
    %162 = tpu.matmul %0, %128, %cst_66 {dimension_numbers = #tpu.dot_dimension_numbers<[1], [0], [0], [1], [0, 0, 1, 1], [], []>} : vector<8x8xf32>, vector<8x8xf32>, vector<8x8xf32> -> vector<8x8xf32>
    %163 = arith.addf %153, %162 : vector<8x8xf32>
    %164 = arith.mulf %163, %161 : vector<8x8xf32>
    %165 = vector.broadcast %157 : vector<1x8xf32> to vector<8x8xf32>
    %166 = arith.mulf %164, %165 : vector<8x8xf32>
    %167 = arith.addf %134, %166 : vector<8x8xf32>
    %168 = arith.addf %151, %153 : vector<8x8xf32>
    %cst_67 = arith.constant dense<0xFF800000> : vector<8xf32>
    %169 = vector.multi_reduction <maximumf>, %168, %cst_67 [0] : vector<8x8xf32> to vector<8xf32>
    %170 = vector.shape_cast %169 : vector<8xf32> to vector<1x8xf32>
    %171 = vector.broadcast %170 : vector<1x8xf32> to vector<8x8xf32>
    %172 = arith.subf %168, %171 : vector<8x8xf32>
    %173 = math.exp %172 : vector<8x8xf32>
    %cst_68 = arith.constant dense<0.000000e+00> : vector<8x8xf32>
    %174 = tpu.matmul %5, %173, %cst_68 {dimension_numbers = #tpu.dot_dimension_numbers<[1], [0], [0], [1], [0, 0, 1, 1], [], []>} : vector<8x8xf32>, vector<8x8xf32>, vector<8x8xf32> -> vector<8x8xf32>
    %175 = math.log %174 : vector<8x8xf32>
    %176 = vector.broadcast %170 : vector<1x8xf32> to vector<8x8xf32>
    %177 = arith.addf %176, %175 : vector<8x8xf32>
    %178 = vector.broadcast %2 : vector<8x1xf32> to vector<8x8xf32>
    %179 = arith.addf %177, %178 : vector<8x8xf32>
    %cst_69 = arith.constant 0.000000e+00 : f32
    %180 = vector.broadcast %cst_69 : f32 to vector<1x8xf32>
    %181 = arith.cmpf ogt, %157, %180 : vector<1x8xf32>
    %182 = vector.shape_cast %181 : vector<1x8xi1> to vector<1x8xi1>
    %183 = vector.broadcast %182 : vector<1x8xi1> to vector<8x8xi1>
    %184 = arith.select %183, %179, %151 : vector<8x8xi1>, vector<8x8xf32>
    %c6 = arith.constant 6 : index
    %c0_70 = arith.constant 0 : index
    %c0_71 = arith.constant 0 : index
    %185 = vector.load %arg1[%c6, %c0_70, %c0_71] : memref<8x8x8xf32, #tpu.memory_space<vmem>>, vector<1x8x8xf32>
    %186 = vector.shape_cast %185 : vector<1x8x8xf32> to vector<8x8xf32>
    %c6_72 = arith.constant 6 : index
    %c0_73 = arith.constant 0 : index
    %c0_74 = arith.constant 0 : index
    %187 = vector.load %arg2[%c6_72, %c0_73, %c0_74] : memref<8x1x8xi32, #tpu.memory_space<vmem>>, vector<1x1x8xi32>
    %188 = vector.shape_cast %187 : vector<1x1x8xi32> to vector<1x8xi32>
    %c6_75 = arith.constant 6 : index
    %c0_76 = arith.constant 0 : index
    %c0_77 = arith.constant 0 : index
    %189 = vector.load %arg3[%c6_75, %c0_76, %c0_77] : memref<8x1x8xf32, #tpu.memory_space<vmem>>, vector<1x1x8xf32>
    %190 = vector.shape_cast %189 : vector<1x1x8xf32> to vector<1x8xf32>
    %191 = vector.broadcast %188 : vector<1x8xi32> to vector<8x8xi32>
    %192 = arith.cmpi eq, %191, %6 : vector<8x8xi32>
    %193 = arith.extui %192 : vector<8x8xi1> to vector<8x8xi32>
    %194 = arith.sitofp %193 : vector<8x8xi32> to vector<8x8xf32>
    %cst_78 = arith.constant dense<0.000000e+00> : vector<8x8xf32>
    %195 = tpu.matmul %0, %161, %cst_78 {dimension_numbers = #tpu.dot_dimension_numbers<[1], [0], [0], [1], [0, 0, 1, 1], [], []>} : vector<8x8xf32>, vector<8x8xf32>, vector<8x8xf32> -> vector<8x8xf32>
    %196 = arith.addf %186, %195 : vector<8x8xf32>
    %197 = arith.mulf %196, %194 : vector<8x8xf32>
    %198 = vector.broadcast %190 : vector<1x8xf32> to vector<8x8xf32>
    %199 = arith.mulf %197, %198 : vector<8x8xf32>
    %200 = arith.addf %167, %199 : vector<8x8xf32>
    %201 = arith.addf %184, %186 : vector<8x8xf32>
    %cst_79 = arith.constant dense<0xFF800000> : vector<8xf32>
    %202 = vector.multi_reduction <maximumf>, %201, %cst_79 [0] : vector<8x8xf32> to vector<8xf32>
    %203 = vector.shape_cast %202 : vector<8xf32> to vector<1x8xf32>
    %204 = vector.broadcast %203 : vector<1x8xf32> to vector<8x8xf32>
    %205 = arith.subf %201, %204 : vector<8x8xf32>
    %206 = math.exp %205 : vector<8x8xf32>
    %cst_80 = arith.constant dense<0.000000e+00> : vector<8x8xf32>
    %207 = tpu.matmul %5, %206, %cst_80 {dimension_numbers = #tpu.dot_dimension_numbers<[1], [0], [0], [1], [0, 0, 1, 1], [], []>} : vector<8x8xf32>, vector<8x8xf32>, vector<8x8xf32> -> vector<8x8xf32>
    %208 = math.log %207 : vector<8x8xf32>
    %209 = vector.broadcast %203 : vector<1x8xf32> to vector<8x8xf32>
    %210 = arith.addf %209, %208 : vector<8x8xf32>
    %211 = vector.broadcast %2 : vector<8x1xf32> to vector<8x8xf32>
    %212 = arith.addf %210, %211 : vector<8x8xf32>
    %cst_81 = arith.constant 0.000000e+00 : f32
    %213 = vector.broadcast %cst_81 : f32 to vector<1x8xf32>
    %214 = arith.cmpf ogt, %190, %213 : vector<1x8xf32>
    %215 = vector.shape_cast %214 : vector<1x8xi1> to vector<1x8xi1>
    %216 = vector.broadcast %215 : vector<1x8xi1> to vector<8x8xi1>
    %217 = arith.select %216, %212, %184 : vector<8x8xi1>, vector<8x8xf32>
    %c7 = arith.constant 7 : index
    %c0_82 = arith.constant 0 : index
    %c0_83 = arith.constant 0 : index
    %218 = vector.load %arg1[%c7, %c0_82, %c0_83] : memref<8x8x8xf32, #tpu.memory_space<vmem>>, vector<1x8x8xf32>
    %219 = vector.shape_cast %218 : vector<1x8x8xf32> to vector<8x8xf32>
    %c7_84 = arith.constant 7 : index
    %c0_85 = arith.constant 0 : index
    %c0_86 = arith.constant 0 : index
    %220 = vector.load %arg2[%c7_84, %c0_85, %c0_86] : memref<8x1x8xi32, #tpu.memory_space<vmem>>, vector<1x1x8xi32>
    %221 = vector.shape_cast %220 : vector<1x1x8xi32> to vector<1x8xi32>
    %c7_87 = arith.constant 7 : index
    %c0_88 = arith.constant 0 : index
    %c0_89 = arith.constant 0 : index
    %222 = vector.load %arg3[%c7_87, %c0_88, %c0_89] : memref<8x1x8xf32, #tpu.memory_space<vmem>>, vector<1x1x8xf32>
    %223 = vector.shape_cast %222 : vector<1x1x8xf32> to vector<1x8xf32>
    %224 = vector.broadcast %221 : vector<1x8xi32> to vector<8x8xi32>
    %225 = arith.cmpi eq, %224, %6 : vector<8x8xi32>
    %226 = arith.extui %225 : vector<8x8xi1> to vector<8x8xi32>
    %227 = arith.sitofp %226 : vector<8x8xi32> to vector<8x8xf32>
    %cst_90 = arith.constant dense<0.000000e+00> : vector<8x8xf32>
    %228 = tpu.matmul %0, %194, %cst_90 {dimension_numbers = #tpu.dot_dimension_numbers<[1], [0], [0], [1], [0, 0, 1, 1], [], []>} : vector<8x8xf32>, vector<8x8xf32>, vector<8x8xf32> -> vector<8x8xf32>
    %229 = arith.addf %219, %228 : vector<8x8xf32>
    %230 = arith.mulf %229, %227 : vector<8x8xf32>
    %231 = vector.broadcast %223 : vector<1x8xf32> to vector<8x8xf32>
    %232 = arith.mulf %230, %231 : vector<8x8xf32>
    %233 = arith.addf %200, %232 : vector<8x8xf32>
    %234 = arith.addf %217, %219 : vector<8x8xf32>
    %cst_91 = arith.constant dense<0xFF800000> : vector<8xf32>
    %235 = vector.multi_reduction <maximumf>, %234, %cst_91 [0] : vector<8x8xf32> to vector<8xf32>
    %236 = vector.shape_cast %235 : vector<8xf32> to vector<1x8xf32>
    %237 = vector.broadcast %236 : vector<1x8xf32> to vector<8x8xf32>
    %238 = arith.subf %234, %237 : vector<8x8xf32>
    %239 = math.exp %238 : vector<8x8xf32>
    %cst_92 = arith.constant dense<0.000000e+00> : vector<8x8xf32>
    %240 = tpu.matmul %5, %239, %cst_92 {dimension_numbers = #tpu.dot_dimension_numbers<[1], [0], [0], [1], [0, 0, 1, 1], [], []>} : vector<8x8xf32>, vector<8x8xf32>, vector<8x8xf32> -> vector<8x8xf32>
    %241 = math.log %240 : vector<8x8xf32>
    %242 = vector.broadcast %236 : vector<1x8xf32> to vector<8x8xf32>
    %243 = arith.addf %242, %241 : vector<8x8xf32>
    %244 = vector.broadcast %2 : vector<8x1xf32> to vector<8x8xf32>
    %245 = arith.addf %243, %244 : vector<8x8xf32>
    %cst_93 = arith.constant 0.000000e+00 : f32
    %246 = vector.broadcast %cst_93 : f32 to vector<1x8xf32>
    %247 = arith.cmpf ogt, %223, %246 : vector<1x8xf32>
    %248 = vector.shape_cast %247 : vector<1x8xi1> to vector<1x8xi1>
    %249 = vector.broadcast %248 : vector<1x8xi1> to vector<8x8xi1>
    %250 = arith.select %249, %245, %217 : vector<8x8xi1>, vector<8x8xf32>
    %cst_94 = arith.constant dense<0xFF800000> : vector<8xf32>
    %251 = vector.multi_reduction <maximumf>, %250, %cst_94 [0] : vector<8x8xf32> to vector<8xf32>
    %252 = vector.shape_cast %251 : vector<8xf32> to vector<1x8xf32>
    %253 = vector.broadcast %252 : vector<1x8xf32> to vector<8x8xf32>
    %254 = arith.subf %250, %253 : vector<8x8xf32>
    %255 = math.exp %254 : vector<8x8xf32>
    %cst_95 = arith.constant dense<0.000000e+00> : vector<8xf32>
    %256 = vector.multi_reduction <add>, %255, %cst_95 [0] : vector<8x8xf32> to vector<8xf32>
    %257 = vector.shape_cast %256 : vector<8xf32> to vector<1x8xf32>
    %258 = math.log %257 : vector<1x8xf32>
    %259 = arith.addf %258, %252 : vector<1x8xf32>
    %260 = vector.shape_cast %259 : vector<1x8xf32> to vector<1x1x8xf32>
    %cst_96 = arith.constant dense<0.000000e+00> : vector<1xf32>
    %261 = vector.multi_reduction <add>, %260, %cst_96 [1, 2] : vector<1x1x8xf32> to vector<1xf32>
    %262 = vector.shape_cast %261 : vector<1xf32> to vector<1x1x1xf32>
    %263 = vector.extract %262[0, 0, 0] : f32 from vector<1x1x1xf32>
    %264 = vector.shape_cast %233 : vector<8x8xf32> to vector<1x8x8xf32>
    %cst_97 = arith.constant dense<0.000000e+00> : vector<1xf32>
    %265 = vector.multi_reduction <add>, %264, %cst_97 [1, 2] : vector<1x8x8xf32> to vector<1xf32>
    %266 = vector.shape_cast %265 : vector<1xf32> to vector<1x1x1xf32>
    %267 = vector.extract %266[0, 0, 0] : f32 from vector<1x1x1xf32>
    %268 = arith.subf %263, %267 : f32
    %c0_98 = arith.constant 0 : index
    %c0_99 = arith.constant 0 : index
    %269 = memref.load %arg5[%c0_98, %c0_99] : memref<1x1xf32, #tpu.memory_space<smem>>
    memref.store %268, %arg5[%c0_98, %c0_99] : memref<1x1xf32, #tpu.memory_space<smem>>
    return
  }
  func.func @transform_0(%arg0: i32) -> (i32, i32, i32) {
    %c0_i32 = arith.constant 0 : i32
    %c0_i32_0 = arith.constant 0 : i32
    %c0_i32_1 = arith.constant 0 : i32
    return %c0_i32, %c0_i32_0, %arg0 : i32, i32, i32
  }
  func.func @transform_1(%arg0: i32) -> (i32, i32, i32) {
    %c0_i32 = arith.constant 0 : i32
    %c0_i32_0 = arith.constant 0 : i32
    %c0_i32_1 = arith.constant 0 : i32
    return %c0_i32, %c0_i32_0, %arg0 : i32, i32, i32
  }
  func.func @transform_2(%arg0: i32) -> (i32, i32, i32) {
    %c0_i32 = arith.constant 0 : i32
    %c0_i32_0 = arith.constant 0 : i32
    %c0_i32_1 = arith.constant 0 : i32
    return %c0_i32, %c0_i32_0, %arg0 : i32, i32, i32
  }
  func.func @transform_3(%arg0: i32) -> (i32, i32) {
    %c0_i32 = arith.constant 0 : i32
    %c0_i32_0 = arith.constant 0 : i32
    %c0_i32_1 = arith.constant 0 : i32
    return %c0_i32, %c0_i32_0 : i32, i32
  }
  func.func @transform_4(%arg0: i32) -> (i32, i32) {
    %c0_i32 = arith.constant 0 : i32
    %c0_i32_0 = arith.constant 0 : i32
    return %arg0, %c0_i32 : i32, i32
  }
}

</mosaic_0001>

<bundles_post_ra>
// kernel: tpu_custom_call.1
= control target key start
LH: loop header
LB: loop body
LE: loop exit
PB: predicated region body
PF: predicated region fallthrough
CT: control target
= control target key end

     0   :  { %9 = vsyncpa [#allocation3], 0  ;;  %s1117_s0 = inlined_call_operand.hbm [shape: f32[8,8,8], index: 0, kind: input, shape index: {}]   ;;  %s1118_s1 = inlined_call_operand.hbm [shape: s32[8,1,8], index: 1, kind: input, shape index: {}]   ;;  %s1119_s2 = inlined_call_operand.hbm [shape: f32[8,1,8], index: 2, kind: input, shape index: {}]   ;;  %s1120_s3 = inlined_call_operand.hbm [shape: f32[8,8], index: 3, kind: input, shape index: {}]   ;;  %s1121_s4 = inlined_call_operand.hbm [shape: f32[1,1], index: 4, kind: output, shape index: {}]  }
   0x1   :  { %10 = vsyncpa [#allocation6], 0 }
   0x2   :  { %11 = vsyncpa [#allocation9], 0  ;;  %s30_s17 = sshll.u32 %s1118_s1, 4  ;;  %s31_s17 = int_to_ptr.hbm [resolvable:$true] %s30_s17 }
   0x3   :  { %12 = vsyncpa [#allocation4], 0  ;;  %s919_s18 = smov [#allocation5]   ;;  %s17_s22 = sshll.u32 %s1117_s0, 4  ;;  %s18_s22 = int_to_ptr.hbm [resolvable:$true] %s17_s22 }
   0x4   :  { %s32_s19 = sshll.u32 %s919_s18, 4  ;;  %s920_s23 = smov 16   ;;  %s33_s19 = int_to_ptr.vmem [resolvable:$true] %s32_s19 }
   0x5   :  { %s921_s24 = smov 1   ;;  %s922_s25 = smov [#allocation2]  }
   0x6   :  { %38 = dma.hbm_to_vmem [thread:$0]  %s31_s17, 128, %s33_s19, [#allocation6], %s920_s23, %s920_s23, %s921_s24  }
   0x7   :  { %s19_s26 = sshll.u32 %s922_s25, 4  ;;  %s923_s27 = smov 128   ;;  %s20_s26 = int_to_ptr.vmem [resolvable:$true] %s19_s26 }
   0x8   :  { %s924_s28 = smov 8   ;;  %s43_s30 = sshll.u32 %s1119_s2, 4  ;;  %s44_s30 = int_to_ptr.hbm [resolvable:$true] %s43_s30 }
   0x9   :  { %25 = dma.hbm_to_vmem [thread:$0]  %s18_s22, 1024, %s20_s26, [#allocation3], %s923_s27, %s923_s27, %s924_s28  }
   0xa   :  { %s925_s5 = smov [#allocation7]   ;;  %s57_s8 = sshll.u32 %s1120_s3, 4  ;;  %s58_s8 = int_to_ptr.hbm [resolvable:$true] %s57_s8 }
   0xb   :  { %s45_s6 = sshll.u32 %s925_s5, 4  ;;  %s926_s9 = smov [#allocation8]   ;;  %s46_s6 = int_to_ptr.vmem [resolvable:$true] %s45_s6 }
   0xc   :  { %51 = dma.hbm_to_vmem [thread:$0]  %s44_s30, 128, %s46_s6, [#allocation6], %s920_s23, %s920_s23, %s921_s24  }
   0xd   :  { %s59_s10 = sshll.u32 %s926_s9, 4  ;;  %s60_s10 = int_to_ptr.vmem [resolvable:$true] %s59_s10 }
   0xe   :  { %62 = dma.hbm_to_vmem [thread:$0]  %s58_s8, 128, %s60_s10, [#allocation9]  }
   0xf   :  { %911 = dma.done.wait [#allocation3], 1024  }
  0x10   :  { %912 = vsyncadd [#allocation3], 4294966272 }
  0x11   :  { %913 = dma.done.wait [#allocation6], 256  }
  0x12   :  { %914 = vsyncadd [#allocation6], 4294967040 }
  0x13   :  { %915 = dma.done.wait [#allocation9], 128  }
  0x14   :  { %916 = vsyncadd [#allocation9], 4294967168  ;;  %vm80_vm0 = vcmask 64512   ;;  %v968_v0 = vld [vmem:[#allocation8] sm:$0xff]  ;;  %v972_v2 = vld [vmem:[#allocation2] sm:$0xff]  ;;  %v927_v21 = vmov 0  }
  0x15   :  { %v81_v1 = vsel %vm80_vm0, %v968_v0, -inf  ;;  %v974_v3 = vld [vmem:[#allocation2 + $0x8] sm:$0xff]  ;;  %v989_v28 = vld [vmem:[#allocation2 + $0x10] sm:$0xff]  ;;  %v998_v49 = vld [vmem:[#allocation2 + $0x18] sm:$0xff]  ;;  %s695_s11 = sshll.u32 %s1121_s4, 4  ;;  %s930_s15 = smov [#allocation10]   ;;  %s696_s11 = int_to_ptr.hbm [resolvable:$true] %s695_s11 }
  0x16   :  { %82 = vmax.xlane.f32.xlu0 %v81_v1  ;;  %v141_v4 = vadd.f32 %v974_v3, %v972_v2  ;;  %v106_v19 = vld [vmem:[#allocation7 + $0x1] sm:$0x1]  ;;  %v189_v41 = vld [vmem:[#allocation7 + $0x2] sm:$0x1]  ;;  %v266_v62 = vld [vmem:[#allocation7 + $0x3] sm:$0x1] }
  0x17   :  { %vm179_vm1 = vcmp.gt.f32.partialorder %v106_v19, 0.0  ;;  %vm256_vm3 = vcmp.gt.f32.partialorder %v189_v41, 0.0  ;;  %vm333_vm5 = vcmp.gt.f32.partialorder %v266_v62, 0.0 }
  0x18   :  { %v142_v5 = vsel %vm80_vm0, %v141_v4, -inf  ;;  %v180_v22 = vsel %vm179_vm1, 1, %v927_v21  ;;  %v257_v43 = vsel %vm256_vm3, 1, %v927_v21  ;;  %v334_v1 = vsel %vm333_vm5, 1, %v927_v21 }
  0x19   :  { %v143_v6 = vrot.slane %v142_v5, 4  ;;  %v181_v24 = vperm.slane %v180_v22, 0  ;;  %v258_v45 = vperm.slane %v257_v43, 0 }
  0x1b   :  { %v144_v7 = vmax.f32 %v142_v5, %v143_v6  ;;  %vm182_vm2 = vcmp.eq.s32.totalorder %v181_v24, 1  ;;  %vm259_vm4 = vcmp.eq.s32.totalorder %v258_v45, 1  ;;  %v335_v5 = vperm.slane %v334_v1, 0 }
  0x1d   :  { %v145_v8 = vrot.slane %v144_v7, 2  ;;  %vm336_vm6 = vcmp.eq.s32.totalorder %v335_v5, 1 }
  0x1f   :  { %v146_v9 = vmax.f32 %v144_v7, %v145_v8 }
  0x21   :  { %v147_v10 = vrot.slane %v146_v9, 1 }
  0x23   :  { %v148_v11 = vmax.f32 %v146_v9, %v147_v10  ;;  %v1006_v9 = vld [vmem:[#allocation2 + $0x20] sm:$0xff] }
  0x25   :  { %v149_v12 = vsub.f32 %v141_v4, %v148_v11 }
  0x27   :  { %v150_v13 = vmul.f32 1.442695, %v149_v12 }
  0x29   :  { %769 = vpow2.f32 %v150_v13 }
  0x2f   :  { %v770_v14 = vpop.eup %769 }
  0x30   :  { %170 = vmatpush.msra.mxu1 %v770_v14 }
  0x89   :  { %v979_v15 = vpop.xlane.xlu0 %82 }
  0x8a   :  { %v84_v16 = vsub.f32 %v968_v0, %v979_v15 }
  0x8c   :  { %v85_v17 = vmul.f32 1.442695, %v84_v16 }
  0x8e   :  { %771 = vpow2.f32 %v85_v17 }
  0x94   :  { %v983_v18 = vpop.eup %771 }
  0x95   :  { %712 = vmatmul.msk.f32.vlgmr.msra.gmra.mxu1 %vm80_vm0, %v983_v18 }
 0x112   :  { %v172_v20 = vpop.f32.mrf.mxu1 }
 0x113   :  { %773 = vlog2.f32 %v172_v20 }
 0x119   :  { %v774_v23 = vpop.eup %773 }
 0x11a   :  { %v176_v25 = vmul.f32 0.6931472, %v774_v23 }
 0x11c   :  { %v177_v26 = vadd.f32 %v176_v25, %v148_v11  ;;  %v343_v25 = vld [vmem:[#allocation7 + $0x4] sm:$0x1] }
 0x11d   :  { %vm410_vm7 = vcmp.gt.f32.partialorder %v343_v25, 0.0 }
 0x11e   :  { %v178_v27 = vadd.f32 %v177_v26, %v979_v15 }
 0x120   :  { %v183_v29 = vsel %vm182_vm2, %v178_v27, %v972_v2  ;;  %v411_v27 = vsel %vm410_vm7, 1, %v927_v21 }
 0x121   :  { %v221_v30 = vadd.f32 %v989_v28, %v183_v29 }
 0x123   :  { %v222_v31 = vsel %vm80_vm0, %v221_v30, -inf }
 0x124   :  { %v223_v32 = vrot.slane %v222_v31, 4 }
 0x126   :  { %v224_v33 = vmax.f32 %v222_v31, %v223_v32 }
 0x128   :  { %v225_v34 = vrot.slane %v224_v33, 2 }
 0x12a   :  { %v226_v35 = vmax.f32 %v224_v33, %v225_v34  ;;  %v1014_v34 = vld [vmem:[#allocation2 + $0x28] sm:$0xff] }
 0x12c   :  { %v227_v36 = vrot.slane %v226_v35, 1 }
 0x12e   :  { %v228_v37 = vmax.f32 %v226_v35, %v227_v36 }
 0x130   :  { %v229_v38 = vsub.f32 %v221_v30, %v228_v37  ;;  %v412_v30 = vperm.slane %v411_v27, 0  ;;  %v758_v27 = vld [vmem:[#allocation5 + $0x4] ss:$0 sm:$0xff] }
 0x132   :  { %v230_v39 = vmul.f32 1.442695, %v229_v38  ;;  %vm413_vm8 = vcmp.eq.s32.totalorder %v412_v30, 1 }
 0x134   :  { %775 = vpow2.f32 %v230_v39 }
 0x13a   :  { %v776_v40 = vpop.eup %775 }
 0x13b   :  { %247 = vmatpush.msra.mxu3 %v776_v40 }
 0x13c   :  { %716 = vmatmul.msk.f32.vlgmr.msra.gmra.mxu3 %vm80_vm0, %v983_v18 }
 0x1bf   :  { %v249_v42 = vpop.f32.mrf.mxu3 }
 0x1c0   :  { %777 = vlog2.f32 %v249_v42 }
 0x1c6   :  { %v778_v44 = vpop.eup %777 }
 0x1c7   :  { %v253_v46 = vmul.f32 0.6931472, %v778_v44 }
 0x1c9   :  { %v254_v47 = vadd.f32 %v253_v46, %v228_v37 }
 0x1cb   :  { %v255_v48 = vadd.f32 %v254_v47, %v979_v15  ;;  %v420_v47 = vld [vmem:[#allocation7 + $0x5] sm:$0x1] }
 0x1cc   :  { %vm487_vm9 = vcmp.gt.f32.partialorder %v420_v47, 0.0 }
 0x1cd   :  { %v260_v50 = vsel %vm259_vm4, %v255_v48, %v183_v29 }
 0x1ce   :  { %v298_v51 = vadd.f32 %v998_v49, %v260_v50 }
 0x1d0   :  { %v299_v52 = vsel %vm80_vm0, %v298_v51, -inf }
 0x1d1   :  { %v300_v53 = vrot.slane %v299_v52, 4 }
 0x1d3   :  { %v301_v54 = vmax.f32 %v299_v52, %v300_v53 }
 0x1d5   :  { %v302_v55 = vrot.slane %v301_v54, 2 }
 0x1d7   :  { %v303_v56 = vmax.f32 %v301_v54, %v302_v55 }
 0x1d9   :  { %v304_v57 = vrot.slane %v303_v56, 1 }
 0x1db   :  { %v305_v58 = vmax.f32 %v303_v56, %v304_v57  ;;  %v1022_v56 = vld [vmem:[#allocation2 + $0x30] sm:$0xff] }
 0x1dd   :  { %v306_v59 = vsub.f32 %v298_v51, %v305_v58 }
 0x1df   :  { %v307_v60 = vmul.f32 1.442695, %v306_v59 }
 0x1e1   :  { %779 = vpow2.f32 %v307_v60 }
 0x1e7   :  { %v780_v61 = vpop.eup %779 }
 0x1e8   :  { %324 = vmatpush.msrb.mxu1 %v780_v61 }
 0x1e9   :  { %720 = vmatmul.msk.f32.vlgmr.msrb.gmra.mxu1 %vm80_vm0, %v983_v18 }
 0x266   :  { %v326_v63 = vpop.f32.mrf.mxu1 }
 0x267   :  { %781 = vlog2.f32 %v326_v63 }
 0x26d   :  { %v782_v4 = vpop.eup %781 }
 0x26e   :  { %v330_v6 = vmul.f32 0.6931472, %v782_v4 }
 0x270   :  { %v331_v7 = vadd.f32 %v330_v6, %v305_v58 }
 0x272   :  { %v332_v8 = vadd.f32 %v331_v7, %v979_v15 }
 0x274   :  { %v337_v10 = vsel %vm336_vm6, %v332_v8, %v260_v50  ;;  %v488_v50 = vsel %vm487_vm9, 1, %v927_v21  ;;  %v497_v8 = vld [vmem:[#allocation7 + $0x6] sm:$0x1] }
 0x275   :  { %v375_v11 = vadd.f32 %v1006_v9, %v337_v10  ;;  %v489_v52 = vperm.slane %v488_v50, 0  ;;  %vm564_vm11 = vcmp.gt.f32.partialorder %v497_v8, 0.0 }
 0x277   :  { %v376_v12 = vsel %vm80_vm0, %v375_v11, -inf  ;;  %vm490_vm10 = vcmp.eq.s32.totalorder %v489_v52, 1 }
 0x278   :  { %v377_v13 = vrot.slane %v376_v12, 4 }
 0x27a   :  { %v378_v14 = vmax.f32 %v376_v12, %v377_v13 }
 0x27c   :  { %v379_v16 = vrot.slane %v378_v14, 2 }
 0x27e   :  { %v380_v17 = vmax.f32 %v378_v14, %v379_v16 }
 0x280   :  { %v381_v19 = vrot.slane %v380_v17, 1 }
 0x282   :  { %v382_v20 = vmax.f32 %v380_v17, %v381_v19  ;;  %v87_v17 = vlaneseq  ;;  %v753_v19 = vld [vmem:[#allocation5] ss:$0 sm:$0xff] }
 0x284   :  { %v383_v22 = vsub.f32 %v375_v11, %v382_v20  ;;  %v565_v11 = vsel %vm564_vm11, 1, %v927_v21  ;;  %v1032_v25 = vshrl.u32 %v87_v17, 7 }
 0x285   :  { %v566_v13 = vperm.slane %v565_v11, 0 }
 0x286   :  { %v384_v23 = vmul.f32 1.442695, %v383_v22  ;;  %v755_v22 = vld [vmem:[#allocation5 + $0x1] ss:$0 sm:$0xff]  ;;  %vm92_vm13 = vcmp.eq.s32.totalorder %v753_v19, %v1032_v25  ;;  %vm345_vm2 = vcmp.eq.s32.totalorder %v758_v27, %v1032_v25 }
 0x287   :  { %vm567_vm12 = vcmp.eq.s32.totalorder %v566_v13, 1  ;;  %vm108_vm14 = vcmp.eq.s32.totalorder %v755_v22, %v1032_v25  ;;  %v765_v22 = vld [vmem:[#allocation7 + $0x5] ss:$0 sm:$0xff] }
 0x288   :  { %783 = vpow2.f32 %v384_v23  ;;  %v756_v23 = vld [vmem:[#allocation5 + $0x2] ss:$0 sm:$0xff] }
 0x289   :  { %vm191_vm15 = vcmp.eq.s32.totalorder %v756_v23, %v1032_v25  ;;  %v767_v23 = vld [vmem:[#allocation5 + $0x7] ss:$0 sm:$0xff] }
 0x28a   :  { %vm576_vm5 = vcmp.eq.s32.totalorder %v767_v23, %v1032_v25 }
 0x28e   :  { %v784_v24 = vpop.eup %783 }
 0x28f   :  { %401 = vmatpush.msrb.mxu3 %v784_v24 }
 0x290   :  { %724 = vmatmul.msk.f32.vlgmr.msrb.gmra.mxu3 %vm80_vm0, %v983_v18 }
 0x313   :  { %v403_v26 = vpop.f32.mrf.mxu3 }
 0x314   :  { %785 = vlog2.f32 %v403_v26  ;;  %v757_v26 = vld [vmem:[#allocation5 + $0x3] ss:$0 sm:$0xff] }
 0x315   :  { %vm268_vm1 = vcmp.eq.s32.totalorder %v757_v26, %v1032_v25 }
 0x31a   :  { %v786_v29 = vpop.eup %785 }
 0x31b   :  { %v407_v31 = vmul.f32 0.6931472, %v786_v29  ;;  %v1034_v29 = vld [vmem:[#allocation5 + $0x5] ss:$0 sm:$0xff] }
 0x31c   :  { %vm422_vm3 = vcmp.eq.s32.totalorder %v1034_v29, %v1032_v25 }
 0x31d   :  { %v408_v32 = vadd.f32 %v407_v31, %v382_v20  ;;  %v1029_v20 = vld [vmem:[#allocation2 + $0x38] sm:$0xff] }
 0x31f   :  { %v409_v33 = vadd.f32 %v408_v32, %v979_v15  ;;  %v928_v32 = vmov 1.0  }
 0x320   :  { %710 = vmatpush.msk.msra.mxu0 %vm92_vm13, %v928_v32  ;;  %714 = vmatpush.msk.msra.mxu2 %vm108_vm14, %v928_v32 }
 0x321   :  { %v414_v35 = vsel %vm413_vm8, %v409_v33, %v337_v10  ;;  %711 = vmatmul.msk.f32.vlgmr.msra.gmra.mxu0 %vm80_vm0, %v968_v0  ;;  %715 = vmatmul.msk.f32.vlgmr.msra.gmra.mxu2 %vm80_vm0, %v968_v0  ;;  %vm666_vm8 = vcmask 57344  }
 0x322   :  { %v452_v36 = vadd.f32 %v1014_v34, %v414_v35  ;;  %718 = vmatpush.msk.msrb.mxu0 %vm191_vm15, %v928_v32  ;;  %722 = vmatpush.msk.msrb.mxu2 %vm268_vm1, %v928_v32 }
 0x324   :  { %v453_v37 = vsel %vm80_vm0, %v452_v36, -inf  ;;  %726 = vmatpush.msk.msra.mxu0 %vm345_vm2, %v928_v32  ;;  %730 = vmatpush.msk.msra.mxu2 %vm422_vm3, %v928_v32 }
 0x325   :  { %v454_v38 = vrot.slane %v453_v37, 4 }
 0x327   :  { %v455_v39 = vmax.f32 %v453_v37, %v454_v38 }
 0x329   :  { %v456_v40 = vrot.slane %v455_v39, 2  ;;  %719 = vmatmul.msk.f32.vlgmr.msrb.gmra.mxu0 %vm80_vm0, %v968_v0  ;;  %723 = vmatmul.msk.f32.vlgmr.msrb.gmra.mxu2 %vm80_vm0, %v968_v0 }
 0x32b   :  { %v457_v41 = vmax.f32 %v455_v39, %v456_v40 }
 0x32d   :  { %v458_v42 = vrot.slane %v457_v41, 1 }
 0x32f   :  { %v459_v43 = vmax.f32 %v457_v41, %v458_v42 }
 0x331   :  { %v460_v44 = vsub.f32 %v452_v36, %v459_v43  ;;  %v760_v36 = vld [vmem:[#allocation5 + $0x6] ss:$0 sm:$0xff]  ;;  %727 = vmatmul.msk.f32.vlgmr.msra.gmra.mxu0 %vm80_vm0, %v968_v0  ;;  %731 = vmatmul.msk.f32.vlgmr.msra.gmra.mxu2 %vm80_vm0, %v968_v0 }
 0x332   :  { %vm499_vm4 = vcmp.eq.s32.totalorder %v760_v36, %v1032_v25 }
 0x333   :  { %v461_v45 = vmul.f32 1.442695, %v460_v44  ;;  %734 = vmatpush.msk.msrb.mxu0 %vm499_vm4, %v928_v32  ;;  %v766_v32 = vld [vmem:[#allocation7 + $0x6] ss:$0 sm:$0xff] }
 0x335   :  { %787 = vpow2.f32 %v461_v45  ;;  %v929_v45 = vmov 0.0  }
 0x336   :  { %v709_v50 = vsel %vm108_vm14, 1.0, %v929_v45  ;;  %v729_v17 = vsel %vm499_vm4, 1.0, %v929_v45 }
 0x339   :  { %735 = vmatmul.msk.f32.vlgmr.msrb.gmra.mxu0 %vm80_vm0, %v968_v0 }
 0x33b   :  { %v788_v46 = vpop.eup %787 }
 0x33c   :  { %478 = vmatpush.msra.mxu1 %v788_v46  ;;  %v708_v46 = vsel %vm92_vm13, 1.0, %v929_v45 }
 0x33d   :  { %728 = vmatmul.msk.f32.vlgmr.msra.gmra.mxu1 %vm80_vm0, %v983_v18  ;;  %v95_v47 = vmul.f32 %v708_v46, %v972_v2 }
 0x39e   :  { %v131_v52 = vpop.f32.mrf.mxu0 }
 0x39f   :  { %v134_v0 = vadd.f32 %v131_v52, %v974_v3 }
 0x3ba   :  { %v480_v48 = vpop.f32.mrf.mxu1 }
 0x3bb   :  { %789 = vlog2.f32 %v480_v48  ;;  %v754_v48 = vld [vmem:[#allocation7] ss:$0 sm:$0xff] }
 0x3c1   :  { %v790_v51 = vpop.eup %789 }
 0x3c2   :  { %v484_v53 = vmul.f32 0.6931472, %v790_v51  ;;  %v713_v51 = vsel %vm191_vm15, 1.0, %v929_v45 }
 0x3c4   :  { %v485_v54 = vadd.f32 %v484_v53, %v459_v43  ;;  %v211_v53 = vpop.f32.mrf.mxu2 }
 0x3c6   :  { %v486_v55 = vadd.f32 %v485_v54, %v979_v15  ;;  %v761_v54 = vld [vmem:[#allocation7 + $0x1] ss:$0 sm:$0xff] }
 0x3c8   :  { %v491_v57 = vsel %vm490_vm10, %v486_v55, %v414_v35  ;;  %v762_v55 = vld [vmem:[#allocation7 + $0x2] ss:$0 sm:$0xff] }
 0x3c9   :  { %v529_v58 = vadd.f32 %v1022_v56, %v491_v57 }
 0x3cb   :  { %v530_v59 = vsel %vm80_vm0, %v529_v58, -inf }
 0x3cc   :  { %v531_v60 = vrot.slane %v530_v59, 4 }
 0x3ce   :  { %v532_v61 = vmax.f32 %v530_v59, %v531_v60 }
 0x3d0   :  { %v533_v62 = vrot.slane %v532_v61, 2 }
 0x3d2   :  { %v534_v63 = vmax.f32 %v532_v61, %v533_v62  ;;  %v717_v62 = vsel %vm268_vm1, 1.0, %v929_v45 }
 0x3d4   :  { %v535_v1 = vrot.slane %v534_v63, 1 }
 0x3d6   :  { %v536_v4 = vmax.f32 %v534_v63, %v535_v1  ;;  %v288_v63 = vpop.f32.mrf.mxu0  ;;  %v721_v1 = vsel %vm345_vm2, 1.0, %v929_v45 }
 0x3d7   :  { %v291_v3 = vadd.f32 %v288_v63, %v998_v49 }
 0x3d8   :  { %v537_v5 = vsub.f32 %v529_v58, %v536_v4  ;;  %v135_v58 = vmul.f32 %v709_v50, %v134_v0 }
 0x3da   :  { %v538_v6 = vmul.f32 1.442695, %v537_v5  ;;  %v139_v60 = vmul.f32 %v761_v54, %v135_v58 }
 0x3dc   :  { %791 = vpow2.f32 %v538_v6  ;;  %v763_v6 = vld [vmem:[#allocation7 + $0x3] ss:$0 sm:$0xff] }
 0x3e2   :  { %v792_v7 = vpop.eup %791 }
 0x3e3   :  { %555 = vmatpush.msra.mxu3 %v792_v7  ;;  %v292_v7 = vmul.f32 %v717_v62, %v291_v3 }
 0x3e4   :  { %732 = vmatmul.msk.f32.vlgmr.msra.gmra.mxu3 %vm80_vm0, %v983_v18 }
 0x3e5   :  { %v296_v11 = vmul.f32 %v763_v6, %v292_v7 }
 0x467   :  { %v557_v10 = vpop.f32.mrf.mxu3 }
 0x468   :  { %793 = vlog2.f32 %v557_v10  ;;  %v764_v10 = vld [vmem:[#allocation7 + $0x4] ss:$0 sm:$0xff] }
 0x46e   :  { %v794_v12 = vpop.eup %793 }
 0x46f   :  { %v561_v14 = vmul.f32 0.6931472, %v794_v12 }
 0x471   :  { %v562_v16 = vadd.f32 %v561_v14, %v536_v4  ;;  %v365_v4 = vpop.f32.mrf.mxu2  ;;  %v725_v14 = vsel %vm422_vm3, 1.0, %v929_v45 }
 0x473   :  { %v563_v24 = vadd.f32 %v562_v16, %v979_v15  ;;  %v442_v16 = vpop.f32.mrf.mxu0 }
 0x474   :  { %v445_v49 = vadd.f32 %v442_v16, %v1014_v34 }
 0x475   :  { %v1036_v30 = vsel %vm567_vm12, %v563_v24, %v491_v57  ;;  %v100_v57 = vmul.f32 %v754_v48, %v95_v47  ;;  %v574_v24 = vld [vmem:[#allocation7 + $0x7] sm:$0x1] }
 0x476   :  { %v606_v31 = vadd.f32 %v1029_v20, %v1036_v30  ;;  %v446_v27 = vmul.f32 %v725_v14, %v445_v49  ;;  %vm641_vm6 = vcmp.gt.f32.partialorder %v574_v24, 0.0 }
 0x477   :  { %v140_v61 = vadd.f32 %v139_v60, %v100_v57  ;;  %v642_v34 = vsel %vm641_vm6, 1, %v927_v21 }
 0x478   :  { %v607_v33 = vsel %vm80_vm0, %v606_v31, -inf  ;;  %v450_v29 = vmul.f32 %v765_v22, %v446_v27 }
 0x479   :  { %v608_v35 = vrot.slane %v607_v33, 4  ;;  %v519_v19 = vpop.f32.mrf.mxu2 }
 0x47b   :  { %v609_v37 = vmax.f32 %v607_v33, %v608_v35 }
 0x47d   :  { %v610_v38 = vrot.slane %v609_v37, 2 }
 0x47f   :  { %v611_v39 = vmax.f32 %v609_v37, %v610_v38  ;;  %v733_v37 = vsel %vm576_vm5, 1.0, %v929_v45  ;;  %v596_v38 = vpop.f32.mrf.mxu0 }
 0x481   :  { %v612_v40 = vrot.slane %v611_v39, 1 }
 0x483   :  { %v1072_v41 = vmax.f32 %v611_v39, %v612_v40  ;;  %v768_v39 = vld [vmem:[#allocation7 + $0x7] ss:$0 sm:$0xff] }
 0x485   :  { %v614_v42 = vsub.f32 %v606_v31, %v1072_v41 }
 0x487   :  { %v615_v43 = vmul.f32 1.442695, %v614_v42 }
 0x489   :  { %795 = vpow2.f32 %v615_v43 }
 0x48f   :  { %v796_v44 = vpop.eup %795 }
 0x490   :  { %632 = vmatpush.msrb.mxu1 %v796_v44  ;;  %v643_v44 = vperm.slane %v642_v34, 0 }
 0x491   :  { %736 = vmatmul.msk.f32.vlgmr.msrb.gmra.mxu1 %vm80_vm0, %v983_v18  ;;  %v214_v18 = vadd.f32 %v211_v53, %v989_v28  ;;  %v368_v28 = vadd.f32 %v365_v4, %v1006_v9  ;;  %v522_v9 = vadd.f32 %v519_v19, %v1022_v56  ;;  %v599_v56 = vadd.f32 %v596_v38, %v1029_v20 }
 0x492   :  { %vm644_vm7 = vcmp.eq.s32.totalorder %v643_v44, 1 }
 0x493   :  { %v215_v59 = vmul.f32 %v713_v51, %v214_v18  ;;  %v369_v8 = vmul.f32 %v721_v1, %v368_v28  ;;  %v523_v31 = vmul.f32 %v729_v17, %v522_v9  ;;  %v600_v42 = vmul.f32 %v733_v37, %v599_v56 }
 0x495   :  { %v219_v2 = vmul.f32 %v762_v55, %v215_v59  ;;  %v373_v13 = vmul.f32 %v764_v10, %v369_v8  ;;  %v527_v35 = vmul.f32 %v766_v32, %v523_v31  ;;  %v604_v47 = vmul.f32 %v768_v39, %v600_v42 }
 0x497   :  { %v220_v5 = vadd.f32 %v219_v2, %v140_v61 }
 0x499   :  { %v297_v12 = vadd.f32 %v296_v11, %v220_v5 }
 0x49b   :  { %v374_v26 = vadd.f32 %v373_v13, %v297_v12 }
 0x49d   :  { %v451_v36 = vadd.f32 %v450_v29, %v374_v26 }
 0x49f   :  { %v528_v43 = vadd.f32 %v527_v35, %v451_v36 }
 0x4a1   :  { %v605_v50 = vadd.f32 %v604_v47, %v528_v43 }
 0x4a3   :  { %v677_v45 = vsel %vm80_vm0, %v605_v50, 0.0 }
 0x4a4   :  { %678 = vadd.xlane.f32.xlu1 %v677_v45 }
 0x50e   :  { %v634_v33 = vpop.f32.mrf.mxu1 }
 0x50f   :  { %797 = vlog2.f32 %v634_v33 }
 0x515   :  { %v798_v40 = vpop.eup %797 }
 0x516   :  { %v638_v46 = vmul.f32 0.6931472, %v798_v40 }
 0x517   :  { %v679_v5 = vpop.xlane.xlu1 %678 }
 0x518   :  { %v639_v48 = vadd.f32 %v638_v46, %v1072_v41  ;;  %v680_v3 = vrot.slane %v679_v5, 4 }
 0x51a   :  { %v640_v25 = vadd.f32 %v639_v48, %v979_v15  ;;  %v681_v6 = vadd.f32 %v680_v3, %v679_v5 }
 0x51c   :  { %v645_v21 = vsel %vm644_vm7, %v640_v25, %v1036_v30  ;;  %v682_v28 = vrot.slane %v681_v6, 2 }
 0x51d   :  { %v646_v20 = vsel %vm80_vm0, %v645_v21, -inf }
 0x51e   :  { %v647_v51 = vrot.slane %v646_v20, 4  ;;  %v683_v11 = vadd.f32 %v682_v28, %v681_v6 }
 0x520   :  { %v648_v52 = vmax.f32 %v646_v20, %v647_v51  ;;  %v684_v14 = vrot.slane %v683_v11, 1 }
 0x522   :  { %v649_v53 = vrot.slane %v648_v52, 2  ;;  %v685_v19 = vadd.f32 %v684_v14, %v683_v11 }
 0x524   :  { %v650_v0 = vmax.f32 %v648_v52, %v649_v53 }
 0x526   :  { %v651_v54 = vrot.slane %v650_v0, 1 }
 0x528   :  { %v652_v18 = vmax.f32 %v650_v0, %v651_v54 }
 0x52a   :  { %v653_v55 = vsub.f32 %v645_v21, %v652_v18 }
 0x52c   :  { %v654_v57 = vmul.f32 1.442695, %v653_v55 }
 0x52e   :  { %799 = vpow2.f32 %v654_v57 }
 0x534   :  { %v800_v41 = vpop.eup %799 }
 0x535   :  { %v656_v58 = vsel %vm80_vm0, %v800_v41, 0.0 }
 0x536   :  { %v657_v15 = vrot.slane %v656_v58, 4 }
 0x538   :  { %v658_v59 = vadd.f32 %v657_v15, %v656_v58 }
 0x53a   :  { %v659_v60 = vrot.slane %v658_v59, 2 }
 0x53c   :  { %v660_v2 = vadd.f32 %v659_v60, %v658_v59 }
 0x53e   :  { %v661_v61 = vrot.slane %v660_v2, 1 }
 0x540   :  { %v662_v30 = vadd.f32 %v661_v61, %v660_v2 }
 0x542   :  { %801 = vlog2.f32 %v662_v30 }
 0x548   :  { %v802_v62 = vpop.eup %801 }
 0x549   :  { %v664_v63 = vmul.f32 0.6931472, %v802_v62 }
 0x54b   :  { %v665_v1 = vadd.f32 %v664_v63, %v652_v18 }
 0x54d   :  { %v667_v4 = vsel %vm666_vm8, %v665_v1, 0.0 }
 0x54e   :  { %668 = vadd.xlane.f32.xlu0 %v667_v4 }
 0x5c1   :  { %v669_v7 = vpop.xlane.xlu0 %668 }
 0x5c2   :  { %v670_v8 = vrot.slane %v669_v7, 4 }
 0x5c4   :  { %v671_v10 = vadd.f32 %v670_v8, %v669_v7 }
 0x5c6   :  { %v672_v12 = vrot.slane %v671_v10, 2 }
 0x5c8   :  { %v673_v13 = vadd.f32 %v672_v12, %v671_v10 }
 0x5ca   :  { %v674_v16 = vrot.slane %v673_v13, 1 }
 0x5cc   :  { %v675_v17 = vadd.f32 %v674_v16, %v673_v13 }
 0x5ce   :  { %737 = vpush %v675_v17 }
 0x5cf   :  { %739 = vpush %v685_v19 }
 0x5ff   :  { %s738_s12 = spop %737 }
 0x600   :  { %s740_s13 = spop %739 }
 0x601   :  { %s687_s14 = ssub.f32 %s738_s12, %s740_s13 }
 0x603   :  { %689 = sst [smem:[#allocation10]] %s687_s14 }
 0x604   :  { %698 = dma.smem_to_hbm %s930_s15, 16, %s696_s11, [#allocation4]  }
 0x605   :  { %917 = dma.done.wait [#allocation4], 16  }
 0x606   :  { %918 = vsyncadd [#allocation4], 4294967280 }
 0x607   :  { %703 = sfence }
 0x608   :  { %704 = vsyncpa [#allocation3], 1 }
 0x609   :  { %705 = vsyncpa [#allocation6], 1 }
 0x60a   :  { %706 = vsyncpa [#allocation9], 1 }
 0x60b   :  { %707 = vsyncpa [#allocation4], 1 }

</bundles_post_ra>
